<compile_context>
chip_gen: v5e
topology: v5e:2x2
jax: 0.10.0
libtpu: 0.0.40
codegen_flags: <defaults>
</compile_context>

<pallas_src>
import math

import jax
import jax.numpy as jnp
from jax.experimental import pallas as pl
from jax.experimental.pallas import tpu as pltpu


def _sigmoid(x):
    return 1.0 / (1.0 + jnp.exp(-x))


def _glstm_cell_kernel(g_ref, cg_ref, h_ref, c_ref, wg_ref, uh_ref, b_ref, out_ref):
    """One batch tile per grid step.

    Ref shapes (per grid step):
      g_ref  : (tb, H)        global node state g
      cg_ref : (tb, H)        global cell state c_g
      h_ref  : (tb, S, H)     word hidden states
      c_ref  : (tb, S, H)     word cell states
      wg_ref : (H, 3H)        [W^T | w^T]   (both bias-free in the module)
      uh_ref : (H, 3H)        [U^T | u^T]
      b_ref  : (1, 3H)        [b_U | b_u]
      out_ref: (tb, 2H)       [new_g | new_c]  (split in the wrapper)
    """
    tb, seq, hid = h_ref.shape
    h2 = 2 * hid
    f32 = jnp.float32

    g = g_ref[...].astype(f32)                       # (tb, H)
    h = h_ref[...].astype(f32)                       # (tb, S, H)

    # ---- g path: single fused MXU matmul -> [W(g) | w(g)] ----
    gproj = jnp.dot(g, wg_ref[...], preferred_element_type=f32)   # (tb, 3H)
    W_g = gproj[:, :h2]                              # W(g)  (tb, 2H)
    w_g = gproj[:, h2:]                              # w(g)  (tb, H)

    # ---- h path: single fused MXU matmul over flattened words ----
    hproj = jnp.dot(
        h.reshape(tb * seq, hid), uh_ref[...], preferred_element_type=f32
    ).reshape(tb, seq, 3 * hid)                      # (tb, S, 3H)

    b = b_ref[...].astype(f32)                       # (1, 3H)
    b_U = b[:, :h2]                                  # (1, 2H)
    b_u = b[:, h2:].reshape(1, 1, hid)               # (1, 1, H)

    # attn_pooling ~ mean over words; linearity => pool the projection.
    U_havg = jnp.mean(hproj[:, :, :h2], axis=1) + b_U          # U(h_avg)  (tb, 2H)
    u_h = hproj[:, :, h2:] + b_u                               # u(h)      (tb, S, H)

    # ---- gates ----
    gates = _sigmoid(W_g + U_havg)                   # (tb, 2H)
    f = gates[:, :hid]
    o = gates[:, hid:]

    # ---- per-word forget weights: sigmoid then softmax over the word dim ----
    f_w = _sigmoid(u_h + w_g[:, None, :])            # (tb, S, H)
    m = jnp.max(f_w, axis=1, keepdims=True)
    e = jnp.exp(f_w - m)
    f_w = e / jnp.sum(e, axis=1, keepdims=True)

    # ---- state update ----
    c = c_ref[...].astype(f32)                       # (tb, S, H)
    c_g = cg_ref[...].astype(f32)                    # (tb, H)
    new_c = f * c_g + jnp.sum(c * f_w, axis=1)       # (tb, H)
    new_g = o * jnp.tanh(new_c)                      # (tb, H)

    out_ref[...] = jnp.concatenate([new_g, new_c], axis=-1).astype(out_ref.dtype)


def glstm_cell_forward(g, c_g, h, c, wg_cat, uh_cat, b_cat, *, batch_block=None):
    """g, c_g: (B, H); h, c: (B, S, H); wg_cat/uh_cat: (H, 3H); b_cat: (1, 3H)."""
    B, S, H = h.shape
    assert g.shape == (B, H) and c_g.shape == (B, H) and c.shape == (B, S, H)
    H3 = wg_cat.shape[1]
    assert H3 == 3 * H and uh_cat.shape == (H, H3) and b_cat.shape == (1, H3)

    tb = B if batch_block is None else min(batch_block, B)
    assert B % tb == 0, "batch tile must divide batch"
    grid = (B // tb,)

    out = pl.pallas_call(
        _glstm_cell_kernel,
        out_shape=jax.ShapeDtypeStruct((B, 2 * H), g.dtype),
        grid_spec=pltpu.PrefetchScalarGridSpec(
            num_scalar_prefetch=0,
            grid=grid,
            in_specs=[
                pl.BlockSpec((tb, H), lambda i: (i, 0)),        # g
                pl.BlockSpec((tb, H), lambda i: (i, 0)),        # c_g
                pl.BlockSpec((tb, S, H), lambda i: (i, 0, 0)),  # h
                pl.BlockSpec((tb, S, H), lambda i: (i, 0, 0)),  # c
                pl.BlockSpec((H, H3), lambda i: (0, 0)),        # [W^T | w^T] (invariant)
                pl.BlockSpec((H, H3), lambda i: (0, 0)),        # [U^T | u^T] (invariant)
                pl.BlockSpec((1, H3), lambda i: (0, 0)),        # [b_U | b_u] (invariant)
            ],
            out_specs=pl.BlockSpec((tb, 2 * H), lambda i: (i, 0)),
        ),
        compiler_params=pltpu.CompilerParams(
            dimension_semantics=("parallel",),   # batch tiles independent
        ),
    )(g, c_g, h, c, wg_cat, uh_cat, b_cat)

    return out[:, :H], out[:, H:]                    # (new_g, new_c)


def make_glstm_params(key, hidden):
    """nn.Linear-style init: U(-1/sqrt(in), 1/sqrt(in)); weights stored transposed."""
    bound = 1.0 / math.sqrt(hidden)
    k = jax.random.split(key, 6)
    W_t = jax.random.uniform(k[0], (hidden, 2 * hidden), jnp.float32, -bound, bound)
    w_t = jax.random.uniform(k[1], (hidden, hidden), jnp.float32, -bound, bound)
    U_t = jax.random.uniform(k[2], (hidden, 2 * hidden), jnp.float32, -bound, bound)
    b_U = jax.random.uniform(k[3], (2 * hidden,), jnp.float32, -bound, bound)
    u_t = jax.random.uniform(k[4], (hidden, hidden), jnp.float32, -bound, bound)
    b_u = jax.random.uniform(k[5], (hidden,), jnp.float32, -bound, bound)
    return W_t, w_t, U_t, u_t, b_U, b_u


def glstm_cell_reference(g, c_g, h, c, params):
    """Pure-JAX reference following the PyTorch forward (attn_pooling = mean)."""
    W_t, w_t, U_t, u_t, b_U, b_u = params
    H = g.shape[-1]
    h_avg = jnp.mean(h, axis=1)
    gates = jax.nn.sigmoid(g @ W_t + (h_avg @ U_t + b_U))
    f, o = gates[:, :H], gates[:, H:]
    f_w = jax.nn.sigmoid((g @ w_t)[:, None, :] + (h @ u_t + b_u))
    f_w = jax.nn.softmax(f_w, axis=-2)
    new_c = f * c_g + jnp.sum(c * f_w, axis=-2)
    new_g = o * jnp.tanh(new_c)
    return new_g, new_c


if __name__ == "__main__":
    # Small shapes consistent with forward(): g/c_g (batch, hidden), h/c (batch, words, hidden).
    B, S, H = 2, 8, 32

    key = jax.random.PRNGKey(0)
    kg, kcg, kh, kc, kp = jax.random.split(key, 5)
    g = jax.random.normal(kg, (B, H), jnp.float32)
    c_g = jax.random.normal(kcg, (B, H), jnp.float32)
    h = jax.random.normal(kh, (B, S, H), jnp.float32)
    c = jax.random.normal(kc, (B, S, H), jnp.float32)

    W_t, w_t, U_t, u_t, b_U, b_u = make_glstm_params(kp, H)

    # Fused, pre-concatenated parameters for the kernel (pure layout prep).
    wg_cat = jnp.concatenate([W_t, w_t], axis=1)                 # (H, 3H)
    uh_cat = jnp.concatenate([U_t, u_t], axis=1)                 # (H, 3H)
    b_cat = jnp.concatenate([b_U, b_u]).reshape(1, 3 * H)        # (1, 3H)

    new_g, new_c = glstm_cell_forward(g, c_g, h, c, wg_cat, uh_cat, b_cat)
    new_g, new_c = jax.block_until_ready((new_g, new_c))

    ref_g, ref_c = glstm_cell_reference(g, c_g, h, c, (W_t, w_t, U_t, u_t, b_U, b_u))
    assert new_g.shape == (B, H) and new_c.shape == (B, H)
    assert jnp.allclose(new_g, ref_g, atol=1e-4, rtol=1e-4), "new_g mismatch vs reference"
    assert jnp.allclose(new_c, ref_c, atol=1e-4, rtol=1e-4), "new_c mismatch vs reference"

    print("KERNEL_OK")
</pallas_src>

<mosaic_0001>
module attributes {stable_mosaic.version = 11 : i64} {
  func.func @_glstm_cell_kernel(%arg0: i32, %arg1: memref<2x32xf32, #tpu.memory_space<vmem>>, %arg2: memref<2x32xf32, #tpu.memory_space<vmem>>, %arg3: memref<2x8x32xf32, #tpu.memory_space<vmem>>, %arg4: memref<2x8x32xf32, #tpu.memory_space<vmem>>, %arg5: memref<32x96xf32, #tpu.memory_space<vmem>>, %arg6: memref<32x96xf32, #tpu.memory_space<vmem>>, %arg7: memref<1x96xf32, #tpu.memory_space<vmem>>, %arg8: memref<2x64xf32, #tpu.memory_space<vmem>>) attributes {dimension_semantics = [#tpu.dimension_semantics<parallel>], iteration_bounds = array<i64: 1>, scalar_prefetch = 0 : i64, scratch_operands = 0 : i64, tpu.core_type = #tpu.core_type<tc>, window_params = [{transform_indices = @transform_0, window_bounds = array<i64: 2, 32>}, {transform_indices = @transform_1, window_bounds = array<i64: 2, 32>}, {transform_indices = @transform_2, window_bounds = array<i64: 2, 8, 32>}, {transform_indices = @transform_3, window_bounds = array<i64: 2, 8, 32>}, {pipeline_mode = #tpu.pipeline_mode<synchronous>, transform_indices = @transform_4, window_bounds = array<i64: 32, 96>}, {pipeline_mode = #tpu.pipeline_mode<synchronous>, transform_indices = @transform_5, window_bounds = array<i64: 32, 96>}, {pipeline_mode = #tpu.pipeline_mode<synchronous>, transform_indices = @transform_6, window_bounds = array<i64: 1, 96>}, {transform_indices = @transform_7, window_bounds = array<i64: 2, 64>}]} {
    %c0 = arith.constant 0 : index
    %c0_0 = arith.constant 0 : index
    %0 = vector.load %arg1[%c0, %c0_0] : memref<2x32xf32, #tpu.memory_space<vmem>>, vector<2x32xf32>
    %c0_1 = arith.constant 0 : index
    %c0_2 = arith.constant 0 : index
    %c0_3 = arith.constant 0 : index
    %1 = vector.load %arg3[%c0_1, %c0_2, %c0_3] : memref<2x8x32xf32, #tpu.memory_space<vmem>>, vector<2x8x32xf32>
    %c0_4 = arith.constant 0 : index
    %c0_5 = arith.constant 0 : index
    %2 = vector.load %arg5[%c0_4, %c0_5] : memref<32x96xf32, #tpu.memory_space<vmem>>, vector<32x96xf32>
    %cst = arith.constant dense<0.000000e+00> : vector<2x96xf32>
    %3 = tpu.matmul %0, %2, %cst {dimension_numbers = #tpu.dot_dimension_numbers<[1], [0], [0], [1], [0, 0, 1, 1], [], []>} : vector<2x32xf32>, vector<32x96xf32>, vector<2x96xf32> -> vector<2x96xf32>
    %4 = vector.extract_strided_slice %3 {offsets = [0, 0], sizes = [2, 64], strides = [1, 1]} : vector<2x96xf32> to vector<2x64xf32>
    %5 = vector.extract_strided_slice %3 {offsets = [0, 64], sizes = [2, 32], strides = [1, 1]} : vector<2x96xf32> to vector<2x32xf32>
    %6 = vector.shape_cast %1 : vector<2x8x32xf32> to vector<16x32xf32>
    %c0_6 = arith.constant 0 : index
    %c0_7 = arith.constant 0 : index
    %7 = vector.load %arg6[%c0_6, %c0_7] : memref<32x96xf32, #tpu.memory_space<vmem>>, vector<32x96xf32>
    %cst_8 = arith.constant dense<0.000000e+00> : vector<16x96xf32>
    %8 = tpu.matmul %6, %7, %cst_8 {dimension_numbers = #tpu.dot_dimension_numbers<[1], [0], [0], [1], [0, 0, 1, 1], [], []>} : vector<16x32xf32>, vector<32x96xf32>, vector<16x96xf32> -> vector<16x96xf32>
    %9 = vector.shape_cast %8 : vector<16x96xf32> to vector<2x8x96xf32>
    %c0_9 = arith.constant 0 : index
    %c0_10 = arith.constant 0 : index
    %10 = vector.load %arg7[%c0_9, %c0_10] : memref<1x96xf32, #tpu.memory_space<vmem>>, vector<1x96xf32>
    %11 = vector.extract_strided_slice %10 {offsets = [0, 0], sizes = [1, 64], strides = [1, 1]} : vector<1x96xf32> to vector<1x64xf32>
    %12 = vector.extract_strided_slice %10 {offsets = [0, 64], sizes = [1, 32], strides = [1, 1]} : vector<1x96xf32> to vector<1x32xf32>
    %13 = vector.shape_cast %12 : vector<1x32xf32> to vector<1x1x32xf32>
    %14 = vector.extract_strided_slice %9 {offsets = [0, 0, 0], sizes = [2, 8, 64], strides = [1, 1, 1]} : vector<2x8x96xf32> to vector<2x8x64xf32>
    %cst_11 = arith.constant dense<0.000000e+00> : vector<2x64xf32>
    %15 = vector.multi_reduction <add>, %14, %cst_11 [1] : vector<2x8x64xf32> to vector<2x64xf32>
    %cst_12 = arith.constant 8.000000e+00 : f32
    %16 = vector.broadcast %cst_12 : f32 to vector<2x64xf32>
    %17 = arith.divf %15, %16 : vector<2x64xf32>
    %18 = vector.broadcast %11 : vector<1x64xf32> to vector<2x64xf32>
    %19 = arith.addf %17, %18 : vector<2x64xf32>
    %20 = vector.extract_strided_slice %9 {offsets = [0, 0, 64], sizes = [2, 8, 32], strides = [1, 1, 1]} : vector<2x8x96xf32> to vector<2x8x32xf32>
    %21 = vector.broadcast %13 : vector<1x1x32xf32> to vector<2x8x32xf32>
    %22 = arith.addf %20, %21 : vector<2x8x32xf32>
    %23 = arith.addf %4, %19 : vector<2x64xf32>
    %cst_13 = arith.constant 0.000000e+00 : f32
    %24 = vector.broadcast %cst_13 : f32 to vector<2x64xf32>
    %25 = arith.subf %24, %23 : vector<2x64xf32>
    %26 = math.exp %25 : vector<2x64xf32>
    %cst_14 = arith.constant 1.000000e+00 : f32
    %27 = vector.broadcast %cst_14 : f32 to vector<2x64xf32>
    %28 = arith.addf %27, %26 : vector<2x64xf32>
    %cst_15 = arith.constant 1.000000e+00 : f32
    %29 = vector.broadcast %cst_15 : f32 to vector<2x64xf32>
    %30 = arith.divf %29, %28 : vector<2x64xf32>
    %31 = vector.extract_strided_slice %30 {offsets = [0, 0], sizes = [2, 32], strides = [1, 1]} : vector<2x64xf32> to vector<2x32xf32>
    %32 = vector.extract_strided_slice %30 {offsets = [0, 32], sizes = [2, 32], strides = [1, 1]} : vector<2x64xf32> to vector<2x32xf32>
    %33 = vector.shape_cast %5 : vector<2x32xf32> to vector<2x1x32xf32>
    %34 = vector.broadcast %33 : vector<2x1x32xf32> to vector<2x8x32xf32>
    %35 = arith.addf %22, %34 : vector<2x8x32xf32>
    %cst_16 = arith.constant 0.000000e+00 : f32
    %36 = vector.broadcast %cst_16 : f32 to vector<2x8x32xf32>
    %37 = arith.subf %36, %35 : vector<2x8x32xf32>
    %38 = math.exp %37 : vector<2x8x32xf32>
    %cst_17 = arith.constant 1.000000e+00 : f32
    %39 = vector.broadcast %cst_17 : f32 to vector<2x8x32xf32>
    %40 = arith.addf %39, %38 : vector<2x8x32xf32>
    %cst_18 = arith.constant 1.000000e+00 : f32
    %41 = vector.broadcast %cst_18 : f32 to vector<2x8x32xf32>
    %42 = arith.divf %41, %40 : vector<2x8x32xf32>
    %cst_19 = arith.constant dense<0xFF800000> : vector<2x32xf32>
    %43 = vector.multi_reduction <maximumf>, %42, %cst_19 [1] : vector<2x8x32xf32> to vector<2x32xf32>
    %44 = vector.shape_cast %43 : vector<2x32xf32> to vector<2x1x32xf32>
    %45 = vector.broadcast %44 : vector<2x1x32xf32> to vector<2x8x32xf32>
    %46 = arith.subf %42, %45 : vector<2x8x32xf32>
    %47 = math.exp %46 : vector<2x8x32xf32>
    %cst_20 = arith.constant dense<0.000000e+00> : vector<2x32xf32>
    %48 = vector.multi_reduction <add>, %47, %cst_20 [1] : vector<2x8x32xf32> to vector<2x32xf32>
    %49 = vector.shape_cast %48 : vector<2x32xf32> to vector<2x1x32xf32>
    %50 = vector.broadcast %49 : vector<2x1x32xf32> to vector<2x8x32xf32>
    %51 = arith.divf %47, %50 : vector<2x8x32xf32>
    %c0_21 = arith.constant 0 : index
    %c0_22 = arith.constant 0 : index
    %c0_23 = arith.constant 0 : index
    %52 = vector.load %arg4[%c0_21, %c0_22, %c0_23] : memref<2x8x32xf32, #tpu.memory_space<vmem>>, vector<2x8x32xf32>
    %c0_24 = arith.constant 0 : index
    %c0_25 = arith.constant 0 : index
    %53 = vector.load %arg2[%c0_24, %c0_25] : memref<2x32xf32, #tpu.memory_space<vmem>>, vector<2x32xf32>
    %54 = arith.mulf %31, %53 : vector<2x32xf32>
    %55 = arith.mulf %52, %51 : vector<2x8x32xf32>
    %cst_26 = arith.constant dense<0.000000e+00> : vector<2x32xf32>
    %56 = vector.multi_reduction <add>, %55, %cst_26 [1] : vector<2x8x32xf32> to vector<2x32xf32>
    %57 = arith.addf %54, %56 : vector<2x32xf32>
    %58 = math.tanh %57 : vector<2x32xf32>
    %59 = arith.mulf %32, %58 : vector<2x32xf32>
    %60 = tpu.concatenate %59, %57 in 1 : vector<2x32xf32>, vector<2x32xf32> -> vector<2x64xf32>
    %c0_27 = arith.constant 0 : index
    %c0_28 = arith.constant 0 : index
    %61 = vector.load %arg8[%c0_27, %c0_28] : memref<2x64xf32, #tpu.memory_space<vmem>>, vector<2x64xf32>
    tpu.vector_store %arg8[%c0_27, %c0_28], %60 {strides = array<i32>} : memref<2x64xf32, #tpu.memory_space<vmem>>, vector<2x64xf32>,
    return
  }
  func.func @transform_0(%arg0: i32) -> (i32, i32) {
    %c0_i32 = arith.constant 0 : i32
    %c0_i32_0 = arith.constant 0 : i32
    return %arg0, %c0_i32 : i32, i32
  }
  func.func @transform_1(%arg0: i32) -> (i32, i32) {
    %c0_i32 = arith.constant 0 : i32
    %c0_i32_0 = arith.constant 0 : i32
    return %arg0, %c0_i32 : i32, i32
  }
  func.func @transform_2(%arg0: i32) -> (i32, i32, i32) {
    %c0_i32 = arith.constant 0 : i32
    %c0_i32_0 = arith.constant 0 : i32
    %c0_i32_1 = arith.constant 0 : i32
    return %arg0, %c0_i32, %c0_i32_0 : i32, i32, i32
  }
  func.func @transform_3(%arg0: i32) -> (i32, i32, i32) {
    %c0_i32 = arith.constant 0 : i32
    %c0_i32_0 = arith.constant 0 : i32
    %c0_i32_1 = arith.constant 0 : i32
    return %arg0, %c0_i32, %c0_i32_0 : i32, i32, i32
  }
  func.func @transform_4(%arg0: i32) -> (i32, i32) {
    %c0_i32 = arith.constant 0 : i32
    %c0_i32_0 = arith.constant 0 : i32
    %c0_i32_1 = arith.constant 0 : i32
    return %c0_i32, %c0_i32_0 : i32, i32
  }
  func.func @transform_5(%arg0: i32) -> (i32, i32) {
    %c0_i32 = arith.constant 0 : i32
    %c0_i32_0 = arith.constant 0 : i32
    %c0_i32_1 = arith.constant 0 : i32
    return %c0_i32, %c0_i32_0 : i32, i32
  }
  func.func @transform_6(%arg0: i32) -> (i32, i32) {
    %c0_i32 = arith.constant 0 : i32
    %c0_i32_0 = arith.constant 0 : i32
    %c0_i32_1 = arith.constant 0 : i32
    return %c0_i32, %c0_i32_0 : i32, i32
  }
  func.func @transform_7(%arg0: i32) -> (i32, i32) {
    %c0_i32 = arith.constant 0 : i32
    %c0_i32_0 = arith.constant 0 : i32
    return %arg0, %c0_i32 : i32, i32
  }
}

</mosaic_0001>

<bundles_post_ra>
// kernel: tpu_custom_call.1
= control target key start
LH: loop header
LB: loop body
LE: loop exit
PB: predicated region body
PF: predicated region fallthrough
CT: control target
= control target key end

     0   :  { %12 = vsyncpa [#allocation3], 0  ;;  %s737_s0 = inlined_call_operand.hbm [shape: f32[2,32], index: 0, kind: input, shape index: {}]   ;;  %s738_s1 = inlined_call_operand.hbm [shape: f32[2,32], index: 1, kind: input, shape index: {}]   ;;  %s739_s2 = inlined_call_operand.hbm [shape: f32[2,8,32], index: 2, kind: input, shape index: {}]   ;;  %s740_s3 = inlined_call_operand.hbm [shape: f32[2,8,32], index: 3, kind: input, shape index: {}]   ;;  %s741_s4 = inlined_call_operand.hbm [shape: f32[32,96], index: 4, kind: input, shape index: {}]   ;;  %s742_s5 = inlined_call_operand.hbm [shape: f32[32,96], index: 5, kind: input, shape index: {}]   ;;  %s743_s6 = inlined_call_operand.vmem [shape: f32[1,96], index: 6, kind: input, shape index: {}]   ;;  %s744_s7 = inlined_call_operand.hbm [shape: f32[2,64], index: 7, kind: output, shape index: {}]  }
   0x1   :  { %13 = vsyncpa [#allocation6], 0 }
   0x2   :  { %14 = vsyncpa [#allocation9], 0 }
   0x3   :  { %15 = vsyncpa [#allocation12], 0  ;;  %s33_s26 = sshll.u32 %s738_s1, 4  ;;  %s34_s26 = int_to_ptr.hbm [resolvable:$true] %s33_s26 }
   0x4   :  { %16 = vsyncpa [#allocation4], 0  ;;  %s643_s27 = smov [#allocation5]   ;;  %s56_s8 = sshll.u32 %s740_s3, 4  ;;  %s57_s8 = int_to_ptr.hbm [resolvable:$true] %s56_s8 }
   0x5   :  { %s35_s28 = sshll.u32 %s643_s27, 4  ;;  %s644_s9 = smov [#allocation8]   ;;  %s36_s28 = int_to_ptr.vmem [resolvable:$true] %s35_s28 }
   0x6   :  { %38 = dma.hbm_to_vmem [thread:$0]  %s34_s26, 32, %s36_s28, [#allocation6]  }
   0x7   :  { %s58_s10 = sshll.u32 %s644_s9, 4  ;;  %s22_s13 = sshll.u32 %s737_s0, 4  ;;  %s59_s10 = int_to_ptr.vmem [resolvable:$true] %s58_s10  ;;  %s23_s13 = int_to_ptr.hbm [resolvable:$true] %s22_s13 }
   0x8   :  { %s645_s1 = smov 128   ;;  %s646_s14 = smov 8  }
   0x9   :  { %64 = dma.hbm_to_vmem [thread:$0]  %s57_s8, 256, %s59_s10, [#allocation9], %s645_s1, %s645_s1, %s646_s14  }
   0xa   :  { %s43_s17 = sshll.u32 %s739_s2, 4  ;;  %s647_s18 = smov [#allocation2]   ;;  %s44_s17 = int_to_ptr.hbm [resolvable:$true] %s43_s17 }
   0xb   :  { %s24_s19 = sshll.u32 %s647_s18, 4  ;;  %s648_s3 = smov [#allocation7]   ;;  %s25_s19 = int_to_ptr.vmem [resolvable:$true] %s24_s19 }
   0xc   :  { %27 = dma.hbm_to_vmem [thread:$0]  %s23_s13, 32, %s25_s19, [#allocation3]  }
   0xd   :  { %s45_s20 = sshll.u32 %s648_s3, 4  ;;  %s69_s0 = sshll.u32 %s741_s4, 4  ;;  %s46_s20 = int_to_ptr.vmem [resolvable:$true] %s45_s20  ;;  %s70_s0 = int_to_ptr.hbm [resolvable:$true] %s69_s0 }
   0xe   :  { %51 = dma.hbm_to_vmem [thread:$0]  %s44_s17, 256, %s46_s20, [#allocation6], %s645_s1, %s645_s1, %s646_s14  }
   0xf   :  { %s82_s25 = sshll.u32 %s742_s5, 4  ;;  %s649_s26 = smov [#allocation10]   ;;  %s83_s25 = int_to_ptr.hbm [resolvable:$true] %s82_s25 }
  0x10   :  { %s71_s2 = sshll.u32 %s649_s26, 4  ;;  %s650_s27 = smov [#allocation11]   ;;  %s72_s2 = int_to_ptr.vmem [resolvable:$true] %s71_s2 }
  0x11   :  { %77 = dma.hbm_to_vmem [thread:$0]  %s70_s0, 512, %s72_s2, [#allocation9], %s645_s1, %s645_s1, %s646_s14  }
  0x12   :  { %s84_s28 = sshll.u32 %s650_s27, 4  ;;  %s85_s28 = int_to_ptr.vmem [resolvable:$true] %s84_s28 }
  0x13   :  { %90 = dma.hbm_to_vmem [thread:$0]  %s83_s25, 512, %s85_s28, [#allocation12], %s645_s1, %s645_s1, %s646_s14  }
  0x14   :  { %633 = dma.done.wait [#allocation3], 32  }
  0x15   :  { %634 = vsyncadd [#allocation3], 4294967264 }
  0x16   :  { %635 = dma.done.wait [#allocation6], 288  }
  0x17   :  { %636 = vsyncadd [#allocation6], 4294967008 }
  0x18   :  { %637 = dma.done.wait [#allocation9], 768  }
  0x19   :  { %638 = vsyncadd [#allocation9], 4294966528 }
  0x1a   :  { %639 = dma.done.wait [#allocation12], 512  }
  0x1b   :  { %640 = vsyncadd [#allocation12], 4294966784  ;;  %v123_v0 = vld [vmem:[#allocation10 + $0x18] sm:$0xff]  ;;  %v122_v2 = vld [vmem:[#allocation10 + $0x10] sm:$0xff]  ;;  %vm124_vm0 = vcmask 261120   ;;  %v651_v11 = vmov 8.0  }
  0x1c   :  { %v151_v1 = vld [vmem:[#allocation11 + $0x18] sm:$0xff]  ;;  %140 = vmatpush.msra.mxu0 %v123_v0  ;;  %v150_v3 = vld [vmem:[#allocation11 + $0x10] sm:$0xff]  ;;  %v121_v4 = vld [vmem:[#allocation10 + $0x8] sm:$0xff]  ;;  %441 = vrcp.f32 %v651_v11  ;;  %vm182_vm1 = vcmask 523264   ;;  %vm216_vm3 = vcmask 1041409   ;;  %vm285_vm7 = vcmask 785920  }
  0x1d   :  { %170 = vmatpush.msra.mxu1 %v151_v1  ;;  %423 = vmatpush.msra.mxu2 %v151_v1  ;;  %v149_v5 = vld [vmem:[#allocation11 + $0x8] sm:$0xff]  ;;  %v120_v6 = vld [vmem:[#allocation10] sm:$0xff]  ;;  %v117_v8 = vld [vmem:[#allocation2] sm:$0x3]  ;;  %s653_s29 = smov 32   ;;  %s654_s30 = smov 96  }
  0x1e   :  { %141 = vmatpush.msra.mxu0 %v122_v2  ;;  %v148_v7 = vld [vmem:[#allocation11] sm:$0xff]  ;;  %v119_v10 = vld [vmem:[#allocation7 + $0x8] sm:$0xff]  ;;  %v440_v14 = vld [vmem:[%s743_s6] ss:$0 sm:$0xff]  ;;  %s652_s6 = smov 64   ;;  %s655_s8 = smov [#allocation13]  }
  0x1f   :  { %171 = vmatpush.msra.mxu1 %v150_v3  ;;  %424 = vmatpush.msra.mxu2 %v150_v3  ;;  %v118_v9 = vld [vmem:[#allocation7] sm:$0xff]  ;;  %s405_s9 = sshll.u32 %s655_s8, 4  ;;  %s407_s12 = sshll.u32 %s744_s7, 4  ;;  %s406_s9 = int_to_ptr.vmem [resolvable:$true] %s405_s9  ;;  %s408_s12 = int_to_ptr.hbm [resolvable:$true] %s407_s12 }
  0x20   :  { %142 = vmatpush.msra.mxu0 %v121_v4 }
  0x21   :  { %172 = vmatpush.msra.mxu1 %v149_v5  ;;  %425 = vmatpush.msra.mxu2 %v149_v5 }
  0x22   :  { %143 = vmatpush.msra.mxu0 %v120_v6  ;;  %v442_v12 = vpop.eup %441 }
  0x23   :  { %173 = vmatpush.msra.mxu1 %v148_v7  ;;  %426 = vmatpush.msra.mxu2 %v148_v7  ;;  %v198_v13 = vmul.f32 8.0, %v442_v12  ;;  %vm202_vm2 = vweird.f32 %v442_v12 }
  0x24   :  { %420 = vmatmul.msk.f32.vlgmr.msra.gmra.mxu0 %vm124_vm0, %v117_v8  ;;  %421 = vmatmul.msk.f32.vlgmr.msra.gmra.mxu1 %vm124_vm0, %v118_v9 }
  0x25   :  { %422 = vmatmul.msk.f32.vlgmr.msra.gmra.mxu2 %vm124_vm0, %v119_v10  ;;  %v199_v15 = vsub.f32 1.0, %v198_v13 }
  0x27   :  { %v200_v22 = vmul.f32 %v442_v12, %v199_v15 }
  0x29   :  { %v201_v28 = vadd.f32 %v442_v12, %v200_v22 }
  0x2b   :  { %v203_v39 = vsel %vm202_vm2, %v442_v12, %v201_v28 }
  0xa1   :  { %v145_v16 = vpop.f32.mrf.mxu0  ;;  %v175_v18 = vpop.f32.mrf.mxu1 }
  0xa2   :  { %v241_v17 = vperm.slane %v145_v16, 0  ;;  %v183_v19 = vsel %vm182_vm1, %v175_v18, 0.0  ;;  %v211_v20 = vadd.f32 %v440_v14, %v175_v18  ;;  %v240_v23 = vrot.slane %v145_v16, 1 }
  0xa3   :  { %v184_v21 = vrot.slane %v183_v19, 4 }
  0xa4   :  { %v245_v24 = vadd.f32 %v241_v17, %v211_v20  ;;  %v242_v30 = vperm.slane %v240_v23, 0 }
  0xa5   :  { %v185_v25 = vadd.f32 %v184_v21, %v183_v19 }
  0xa6   :  { %v247_v26 = vsub.f32 0.0, %v245_v24 }
  0xa7   :  { %v186_v27 = vrot.slane %v185_v25, 2 }
  0xa8   :  { %v178_v29 = vpop.f32.mrf.mxu2  ;;  %v249_v31 = vmul.f32 1.442695, %v247_v26 }
  0xa9   :  { %v190_v32 = vsel %vm182_vm1, %v178_v29, 0.0  ;;  %v212_v33 = vadd.f32 %v440_v14, %v178_v29  ;;  %v187_v34 = vadd.f32 %v186_v27, %v185_v25 }
  0xaa   :  { %v191_v35 = vrot.slane %v190_v32, 4  ;;  %443 = vpow2.f32 %v249_v31 }
  0xab   :  { %v246_v36 = vadd.f32 %v242_v30, %v212_v33  ;;  %v188_v37 = vrot.slane %v187_v34, 1 }
  0xac   :  { %v192_v38 = vadd.f32 %v191_v35, %v190_v32 }
  0xad   :  { %v248_v40 = vsub.f32 0.0, %v246_v36  ;;  %v189_v41 = vadd.f32 %v188_v37, %v187_v34 }
  0xae   :  { %v193_v42 = vrot.slane %v192_v38, 2 }
  0xaf   :  { %v251_v43 = vmul.f32 1.442695, %v248_v40  ;;  %v204_v44 = vmul.f32 %v203_v39, %v189_v41 }
  0xb0   :  { %v194_v45 = vadd.f32 %v193_v42, %v192_v38  ;;  %v444_v46 = vpop.eup %443 }
  0xb1   :  { %445 = vpow2.f32 %v251_v43  ;;  %v209_v47 = vadd.f32 %v440_v14, %v204_v44  ;;  %v253_v48 = vadd.f32 1.0, %v444_v46 }
  0xb2   :  { %v195_v49 = vrot.slane %v194_v45, 1 }
  0xb3   :  { %447 = vrcp.f32 %v253_v48  ;;  %v266_v61 = vand.u32 2147483648, %v253_v48  ;;  %v264_v63 = vand.u32 2147483647, %v253_v48  ;;  %vm260_vm5 = vweird.f32 %v253_v48 }
  0xb4   :  { %v196_v50 = vadd.f32 %v195_v49, %v194_v45 }
  0xb5   :  { %v267_v3 = vor.u32 1.1754944e-38, %v266_v61  ;;  %vm265_vm8 = vcmp.eq.f32.partialorder %v264_v63, 8.507059e+37 }
  0xb6   :  { %v205_v51 = vmul.f32 %v203_v39, %v196_v50 }
  0xb7   :  { %v446_v52 = vpop.eup %445 }
  0xb8   :  { %v210_v53 = vadd.f32 %v440_v14, %v205_v51  ;;  %v254_v54 = vadd.f32 1.0, %v446_v52 }
  0xb9   :  { %v448_v55 = vpop.eup %447 }
  0xba   :  { %v215_v56 = vrot.slane %v210_v53, 7  ;;  %449 = vrcp.f32 %v254_v54  ;;  %v256_v57 = vmul.f32 %v448_v55, %v253_v48  ;;  %vm261_vm4 = vweird.f32 %v448_v55 }
  0xbb   :  { %vm262_vm6 = vmor %vm260_vm5, %vm261_vm4  ;;  %v281_v7 = vand.u32 2147483648, %v254_v54  ;;  %v279_v10 = vand.u32 2147483647, %v254_v54  ;;  %vm275_vm10 = vweird.f32 %v254_v54 }
  0xbc   :  { %v217_v58 = vsel %vm216_vm3, %v215_v56, %v209_v47  ;;  %v257_v59 = vsub.f32 1.0, %v256_v57 }
  0xbd   :  { %v723_v60 = vadd.f32 %v217_v58, %v145_v16  ;;  %v282_v14 = vor.u32 1.1754944e-38, %v281_v7  ;;  %vm280_vm12 = vcmp.eq.f32.partialorder %v279_v10, 8.507059e+37 }
  0xbe   :  { %v258_v62 = vmul.f32 %v448_v55, %v257_v59 }
  0xbf   :  { %v220_v7 = vsub.f32 0.0, %v723_v60 }
  0xc0   :  { %v450_v0 = vpop.eup %449  ;;  %v259_v2 = vadd.f32 %v448_v55, %v258_v62 }
  0xc1   :  { %v271_v1 = vmul.f32 %v450_v0, %v254_v54  ;;  %vm276_vm9 = vweird.f32 %v450_v0 }
  0xc2   :  { %v263_v5 = vsel %vm262_vm6, %v448_v55, %v259_v2  ;;  %vm277_vm11 = vmor %vm275_vm10, %vm276_vm9 }
  0xc3   :  { %v272_v4 = vsub.f32 1.0, %v271_v1  ;;  %v268_v6 = vsel %vm265_vm8, %v267_v3, %v263_v5 }
  0xc4   :  { %v286_v9 = vsel %vm285_vm7, %v268_v6, -inf }
  0xc5   :  { %v273_v8 = vmul.f32 %v450_v0, %v272_v4  ;;  %v287_v11 = vrot.slane %v286_v9, 4 }
  0xc7   :  { %v274_v12 = vadd.f32 %v450_v0, %v273_v8  ;;  %v288_v13 = vmax.f32 %v286_v9, %v287_v11  ;;  %v221_v8 = vmul.f32 1.442695, %v220_v7 }
  0xc9   :  { %v278_v15 = vsel %vm277_vm11, %v450_v0, %v274_v12  ;;  %v289_v16 = vrot.slane %v288_v13, 2  ;;  %v350_v12 = vld [vmem:[#allocation8] sm:$0xff]  ;;  %vm398_vm11 = vcmask 517120  }
  0xca   :  { %v283_v17 = vsel %vm280_vm12, %v282_v14, %v278_v15 }
  0xcb   :  { %v293_v18 = vsel %vm285_vm7, %v283_v17, -inf  ;;  %v290_v19 = vmax.f32 %v288_v13, %v289_v16 }
  0xcc   :  { %v294_v20 = vrot.slane %v293_v18, 4 }
  0xcd   :  { %v291_v21 = vrot.slane %v290_v19, 1 }
  0xce   :  { %v295_v22 = vmax.f32 %v293_v18, %v294_v20  ;;  %v351_v20 = vld [vmem:[#allocation8 + $0x8] sm:$0xff] }
  0xcf   :  { %v292_v23 = vmax.f32 %v290_v19, %v291_v21 }
  0xd0   :  { %v296_v24 = vrot.slane %v295_v22, 2 }
  0xd1   :  { %v300_v25 = vsub.f32 %v268_v6, %v292_v23 }
  0xd2   :  { %v297_v26 = vmax.f32 %v295_v22, %v296_v24 }
  0xd3   :  { %v302_v27 = vmul.f32 1.442695, %v300_v25 }
  0xd4   :  { %v298_v28 = vrot.slane %v297_v26, 1 }
  0xd5   :  { %451 = vpow2.f32 %v302_v27 }
  0xd6   :  { %v299_v29 = vmax.f32 %v297_v26, %v298_v28 }
  0xd8   :  { %v301_v30 = vsub.f32 %v283_v17, %v299_v29 }
  0xda   :  { %v304_v31 = vmul.f32 1.442695, %v301_v30 }
  0xdb   :  { %v452_v32 = vpop.eup %451 }
  0xdc   :  { %453 = vpow2.f32 %v304_v31  ;;  %v306_v33 = vsel %vm285_vm7, %v452_v32, 0.0 }
  0xdd   :  { %v307_v34 = vrot.slane %v306_v33, 4 }
  0xdf   :  { %v308_v35 = vadd.f32 %v307_v34, %v306_v33 }
  0xe1   :  { %v309_v37 = vrot.slane %v308_v35, 2 }
  0xe2   :  { %v454_v36 = vpop.eup %453 }
  0xe3   :  { %v313_v38 = vsel %vm285_vm7, %v454_v36, 0.0  ;;  %v310_v39 = vadd.f32 %v309_v37, %v308_v35 }
  0xe4   :  { %v314_v40 = vrot.slane %v313_v38, 4 }
  0xe5   :  { %v311_v41 = vrot.slane %v310_v39, 1 }
  0xe6   :  { %v315_v42 = vadd.f32 %v314_v40, %v313_v38  ;;  %v352_v38 = vld [vmem:[#allocation5] sm:$0x3] }
  0xe7   :  { %v312_v43 = vadd.f32 %v311_v41, %v310_v39 }
  0xe8   :  { %v316_v44 = vrot.slane %v315_v42, 2 }
  0xe9   :  { %455 = vrcp.f32 %v312_v43  ;;  %v331_v51 = vand.u32 2147483648, %v312_v43  ;;  %v329_v53 = vand.u32 2147483647, %v312_v43  ;;  %vm325_vm14 = vweird.f32 %v312_v43 }
  0xea   :  { %v317_v45 = vadd.f32 %v316_v44, %v315_v42 }
  0xeb   :  { %v332_v56 = vor.u32 1.1754944e-38, %v331_v51  ;;  %vm330_vm1 = vcmp.eq.f32.partialorder %v329_v53, 8.507059e+37 }
  0xec   :  { %v318_v46 = vrot.slane %v317_v45, 1 }
  0xee   :  { %v319_v47 = vadd.f32 %v318_v46, %v317_v45 }
  0xef   :  { %v456_v48 = vpop.eup %455 }
  0xf0   :  { %v321_v49 = vmul.f32 %v456_v48, %v312_v43  ;;  %457 = vrcp.f32 %v319_v47  ;;  %vm326_vm13 = vweird.f32 %v456_v48  ;;  %v346_v63 = vand.u32 2147483648, %v319_v47 }
  0xf1   :  { %vm327_vm15 = vmor %vm325_vm14, %vm326_vm13  ;;  %v344_v1 = vand.u32 2147483647, %v319_v47  ;;  %vm340_vm4 = vweird.f32 %v319_v47  ;;  %459 = vpow2.f32 %v221_v8 }
  0xf2   :  { %v322_v50 = vsub.f32 1.0, %v321_v49  ;;  %v347_v3 = vor.u32 1.1754944e-38, %v346_v63 }
  0xf3   :  { %vm345_vm6 = vcmp.eq.f32.partialorder %v344_v1, 8.507059e+37 }
  0xf4   :  { %v323_v52 = vmul.f32 %v456_v48, %v322_v50 }
  0xf6   :  { %v458_v54 = vpop.eup %457  ;;  %v324_v55 = vadd.f32 %v456_v48, %v323_v52 }
  0xf7   :  { %v336_v57 = vmul.f32 %v458_v54, %v319_v47  ;;  %vm341_vm2 = vweird.f32 %v458_v54  ;;  %v460_v9 = vpop.eup %459 }
  0xf8   :  { %v328_v58 = vsel %vm327_vm15, %v456_v48, %v324_v55  ;;  %vm342_vm5 = vmor %vm340_vm4, %vm341_vm2  ;;  %v223_v10 = vadd.f32 1.0, %v460_v9 }
  0xf9   :  { %v333_v59 = vsel %vm330_vm1, %v332_v56, %v328_v58  ;;  %v337_v61 = vsub.f32 1.0, %v336_v57 }
  0xfa   :  { %v334_v62 = vmul.f32 %v452_v32, %v333_v59  ;;  %461 = vrcp.f32 %v223_v10  ;;  %v235_v29 = vand.u32 2147483648, %v223_v10  ;;  %vm229_vm8 = vweird.f32 %v223_v10 }
  0xfb   :  { %v338_v0 = vmul.f32 %v458_v54, %v337_v61  ;;  %v233_v30 = vand.u32 2147483647, %v223_v10 }
  0xfc   :  { %356 = vrot.lane.b32.xlu0 %v334_v62, %s652_s6  ;;  %v236_v35 = vor.u32 1.1754944e-38, %v235_v29 }
  0xfd   :  { %v339_v2 = vadd.f32 %v458_v54, %v338_v0  ;;  %vm234_vm10 = vcmp.eq.f32.partialorder %v233_v30, 8.507059e+37 }
  0xff   :  { %v343_v4 = vsel %vm342_vm5, %v458_v54, %v339_v2 }
 0x100   :  { %v348_v5 = vsel %vm345_vm6, %v347_v3, %v343_v4  ;;  %v462_v11 = vpop.eup %461 }
 0x101   :  { %v349_v6 = vmul.f32 %v454_v36, %v348_v5  ;;  %v225_v15 = vmul.f32 %v462_v11, %v223_v10  ;;  %vm230_vm7 = vweird.f32 %v462_v11 }
 0x102   :  { %vm231_vm9 = vmor %vm229_vm8, %vm230_vm7 }
 0x103   :  { %v226_v18 = vsub.f32 1.0, %v225_v15 }
 0x104   :  { %358 = vrot.lane.b32.xlu0 %v349_v6, %s652_s6 }
 0x105   :  { %v227_v23 = vmul.f32 %v462_v11, %v226_v18 }
 0x107   :  { %v228_v26 = vadd.f32 %v462_v11, %v227_v23 }
 0x109   :  { %v232_v32 = vsel %vm231_vm9, %v462_v11, %v228_v26 }
 0x10a   :  { %v237_v37 = vsel %vm234_vm10, %v236_v35, %v232_v32 }
 0x10b   :  { %v353_v41 = vmul.f32 %v352_v38, %v237_v37 }
 0x16e   :  { %v357_v13 = vpop.permute.xlu0 %356 }
 0x16f   :  { %v362_v14 = vmul.f32 %v357_v13, %v350_v12 }
 0x171   :  { %v364_v16 = vsel %vm124_vm0, %v362_v14, 0.0 }
 0x172   :  { %v365_v17 = vrot.slane %v364_v16, 4 }
 0x174   :  { %v366_v19 = vadd.f32 %v365_v17, %v364_v16 }
 0x176   :  { %v359_v21 = vpop.permute.xlu0 %358  ;;  %v367_v60 = vrot.slane %v366_v19, 2 }
 0x177   :  { %v363_v22 = vmul.f32 %v359_v21, %v351_v20 }
 0x178   :  { %v368_v27 = vadd.f32 %v367_v60, %v366_v19 }
 0x179   :  { %v371_v24 = vsel %vm124_vm0, %v363_v22, 0.0 }
 0x17a   :  { %v372_v25 = vrot.slane %v371_v24, 4  ;;  %v369_v33 = vrot.slane %v368_v27, 1 }
 0x17c   :  { %v373_v28 = vadd.f32 %v372_v25, %v371_v24  ;;  %v370_v39 = vadd.f32 %v369_v33, %v368_v27 }
 0x17e   :  { %v374_v31 = vrot.slane %v373_v28, 2 }
 0x180   :  { %v375_v34 = vadd.f32 %v374_v31, %v373_v28 }
 0x182   :  { %v376_v36 = vrot.slane %v375_v34, 1 }
 0x184   :  { %v377_v40 = vadd.f32 %v376_v36, %v375_v34 }
 0x186   :  { %v380_v42 = vsel %vm216_vm3, %v377_v40, %v370_v39 }
 0x187   :  { %v382_v43 = vadd.f32 %v380_v42, %v353_v41 }
 0x189   :  { %394 = vrot.lane.b32.xlu2 %v382_v43, %s653_s29  ;;  %463 = vtanh.f32 %v382_v43 }
 0x18f   :  { %v464_v44 = vpop.eup %463 }
 0x190   :  { %385 = vrot.lane.b32.xlu1 %v464_v44, %s653_s29 }
 0x1e3   :  { %v395_v47 = vpop.permute.xlu2 %394 }
 0x202   :  { %v386_v45 = vpop.permute.xlu1 %385 }
 0x203   :  { %v388_v46 = vmul.f32 %v386_v45, %v237_v37 }
 0x205   :  { %390 = vrot.lane.b32.xlu1 %v388_v46, %s654_s30 }
 0x277   :  { %v391_v48 = vpop.permute.xlu1 %390 }
 0x278   :  { %v397_v49 = vsel %vm124_vm0, %v391_v48, %v395_v47 }
 0x279   :  { %399 = vst.msk [vmem:[#allocation13] sm:$0x3] %vm398_vm11, %v397_v49 }
 0x27a   :  { %410 = dma.vmem_to_hbm [thread:$0]  %s406_s9, 32, %s408_s12, [#allocation4]  }
 0x27b   :  { %641 = dma.done.wait [#allocation4], 32  }
 0x27c   :  { %642 = vsyncadd [#allocation4], 4294967264 }
 0x27d   :  { %415 = vsyncpa [#allocation3], 1 }
 0x27e   :  { %416 = vsyncpa [#allocation6], 1 }
 0x27f   :  { %417 = vsyncpa [#allocation9], 1 }
 0x280   :  { %418 = vsyncpa [#allocation12], 1 }
 0x281   :  { %419 = vsyncpa [#allocation4], 1 }

</bundles_post_ra>
